<compile_context>
chip_gen: v6e
topology: v6e:2x2x1
jax: 0.10.0
libtpu: 0.0.40
codegen_flags: <defaults>
</compile_context>

<pallas_src>
import functools

import jax
import jax.numpy as jnp
from jax.experimental import pallas as pl
from jax.experimental.pallas import tpu as pltpu


def _deconv_mm_kernel(x_ref, w_ref, b_ref, o_ref):
    # x_ref: (1, Cin, tn)   w_ref: (Cout*k*k, Cin)   b_ref: (Cout*k*k, 1)
    # o_ref: (1, Cout*k*k, tn)   -- lane dim = tn (>=128, multiple of 128)
    acc = jnp.dot(w_ref[...], x_ref[0], preferred_element_type=jnp.float32)
    o_ref[0] = (acc + b_ref[...]).astype(o_ref.dtype)


def _pallas_deconv_matmul(x_flat, w_t, b_col, *, max_tile=2048):
    """x_flat: (N, Cin, M)  w_t: (CoKK, Cin)  b_col: (CoKK, 1) -> (N, CoKK, M)."""
    N, Cin, M = x_flat.shape
    CoKK = w_t.shape[0]

    # Lane-dense tile: multiple of 128, as big as reasonable (few grid steps),
    # capped so the double-buffered (x + out) tiles stay well under scoped VMEM
    # on every generation (v5e/v6e: 128 MiB, v7x: 64 MiB physical / 32 scoped).
    tn = min(max_tile, pl.cdiv(M, 128) * 128)
    n_tiles = pl.cdiv(M, tn)
    M_pad = n_tiles * tn
    if M_pad != M:
        x_flat = jnp.pad(x_flat, ((0, 0), (0, 0), (0, M_pad - M)))

    out = pl.pallas_call(
        _deconv_mm_kernel,
        out_shape=jax.ShapeDtypeStruct((N, CoKK, M_pad), jnp.float32),
        grid_spec=pltpu.PrefetchScalarGridSpec(
            num_scalar_prefetch=0,
            grid=(N, n_tiles),
            in_specs=[
                pl.BlockSpec((1, Cin, tn), lambda n, j: (n, 0, j)),   # activations
                pl.BlockSpec((CoKK, Cin), lambda n, j: (0, 0)),       # full weight
                pl.BlockSpec((CoKK, 1), lambda n, j: (0, 0)),         # bias column
            ],
            out_specs=pl.BlockSpec((1, CoKK, tn), lambda n, j: (n, 0, j)),
        ),
        compiler_params=pltpu.CompilerParams(
            dimension_semantics=("parallel", "parallel")),
    )(x_flat, w_t, b_col)

    if M_pad != M:
        out = out[:, :, :M]
    return out


def process_layer_graph(x_nchw, weight, bias, *, kernel_size, stride):
    """ConvTranspose2d(in_feats, out_feats, kernel_size, stride, padding=0).

    x_nchw : (N, Cin, H, W)  float32
    weight : (Cin, Cout, k, k)   (PyTorch ConvTranspose2d weight layout)
    bias   : (Cout,)
    returns: (N, Cout, H*stride, W*stride)   for kernel_size == stride
    """
    # TODO(synk): kernel_size != stride (overlapping taps) would need an
    # overlap-add scatter after the matmul; not implemented here.
    assert kernel_size == stride, "non-overlapping transposed conv only (k == stride)"
    N, Cin, H, W = x_nchw.shape
    Cin_w, Cout, k, _ = weight.shape
    assert Cin_w == Cin and k == kernel_size

    M = H * W
    # NCHW per-batch is already channel-major: pure reshape, no transpose.
    x_flat = x_nchw.reshape(N, Cin, M)
    # weight -> (Cout*k*k, Cin), rows ordered (co, ki, kj)  (tiny tensor)
    w_t = jnp.transpose(weight, (1, 2, 3, 0)).reshape(Cout * k * k, Cin)
    b_col = jnp.repeat(bias, k * k).reshape(Cout * k * k, 1)

    y = _pallas_deconv_matmul(x_flat, w_t, b_col)            # (N, Cout*k*k, H*W)

    # pixel-shuffle back to NCHW:
    # (N,Cout,k,k,H,W) -> (N,Cout,H,k,W,k) -> (N,Cout,H*k,W*k)
    # TODO(synk): this rearrange is still one wrapper-side XLA transpose of the
    # output; fully fusing it in-kernel needs strided lane/sublane stores.
    y = y.reshape(N, Cout, k, k, H, W)
    y = jnp.transpose(y, (0, 1, 4, 2, 5, 3)).reshape(N, Cout, H * k, W * k)
    return y


if __name__ == "__main__":
    # Module config: ProcessLayer_Graph(in_feats=4, out_feats=8, kernel_size=2, stride=2)
    in_feats, out_feats, ksize, stride = 4, 8, 2, 2
    N, H, W = 2, 16, 16

    key = jax.random.PRNGKey(0)
    kx, kw, kb = jax.random.split(key, 3)
    x = jax.random.normal(kx, (N, in_feats, H, W), dtype=jnp.float32)
    # deterministic synthetic parameters (shapes match nn.ConvTranspose2d)
    weight = jax.random.normal(kw, (in_feats, out_feats, ksize, ksize),
                               dtype=jnp.float32) * 0.1
    bias = jax.random.normal(kb, (out_feats,), dtype=jnp.float32) * 0.1

    fwd = jax.jit(functools.partial(process_layer_graph,
                                    kernel_size=ksize, stride=stride))
    y = jax.block_until_ready(fwd(x, weight, bias))

    # pure-JAX reference (same transposed-conv semantics)
    ref = jnp.einsum("nchw,cokl->nohkwl", x, weight).reshape(
        N, out_feats, H * ksize, W * ksize) + bias[None, :, None, None]
    assert y.shape == (N, out_feats, H * stride, W * stride)
    assert jnp.allclose(y, ref, atol=1e-5, rtol=1e-5)

    print("KERNEL_OK")
</pallas_src>

<mosaic_0001>
module attributes {stable_mosaic.version = 11 : i64} {
  func.func @_deconv_mm_kernel(%arg0: i32, %arg1: i32, %arg2: memref<1x4x256xf32, #tpu.memory_space<vmem>>, %arg3: memref<32x4xf32, #tpu.memory_space<vmem>>, %arg4: memref<32x1xf32, #tpu.memory_space<vmem>>, %arg5: memref<1x32x256xf32, #tpu.memory_space<vmem>>) attributes {dimension_semantics = [#tpu.dimension_semantics<parallel>, #tpu.dimension_semantics<parallel>], iteration_bounds = array<i64: 2, 1>, scalar_prefetch = 0 : i64, scratch_operands = 0 : i64, tpu.core_type = #tpu.core_type<tc>, window_params = [{transform_indices = @transform_0, window_bounds = array<i64: 1, 4, 256>}, {pipeline_mode = #tpu.pipeline_mode<synchronous>, transform_indices = @transform_1, window_bounds = array<i64: 32, 4>}, {pipeline_mode = #tpu.pipeline_mode<synchronous>, transform_indices = @transform_2, window_bounds = array<i64: 32, 1>}, {transform_indices = @transform_3, window_bounds = array<i64: 1, 32, 256>}]} {
    %c0 = arith.constant 0 : index
    %c0_0 = arith.constant 0 : index
    %0 = vector.load %arg3[%c0, %c0_0] : memref<32x4xf32, #tpu.memory_space<vmem>>, vector<32x4xf32>
    %c0_1 = arith.constant 0 : index
    %c0_2 = arith.constant 0 : index
    %c0_3 = arith.constant 0 : index
    %1 = vector.load %arg2[%c0_1, %c0_2, %c0_3] : memref<1x4x256xf32, #tpu.memory_space<vmem>>, vector<1x4x256xf32>
    %2 = vector.shape_cast %1 : vector<1x4x256xf32> to vector<4x256xf32>
    %cst = arith.constant dense<0.000000e+00> : vector<32x256xf32>
    %3 = tpu.matmul %0, %2, %cst {dimension_numbers = #tpu.dot_dimension_numbers<[1], [0], [0], [1], [0, 0, 1, 1], [], []>} : vector<32x4xf32>, vector<4x256xf32>, vector<32x256xf32> -> vector<32x256xf32>
    %c0_4 = arith.constant 0 : index
    %c0_5 = arith.constant 0 : index
    %4 = vector.load %arg4[%c0_4, %c0_5] : memref<32x1xf32, #tpu.memory_space<vmem>>, vector<32x1xf32>
    %5 = vector.broadcast %4 : vector<32x1xf32> to vector<32x256xf32>
    %6 = arith.addf %3, %5 : vector<32x256xf32>
    %c0_6 = arith.constant 0 : index
    %c0_7 = arith.constant 0 : index
    %c0_8 = arith.constant 0 : index
    %7 = vector.load %arg5[%c0_6, %c0_7, %c0_8] : memref<1x32x256xf32, #tpu.memory_space<vmem>>, vector<1x32x256xf32>
    %8 = vector.shape_cast %7 : vector<1x32x256xf32> to vector<32x256xf32>
    %9 = vector.shape_cast %6 : vector<32x256xf32> to vector<1x32x256xf32>
    tpu.vector_store %arg5[%c0_6, %c0_7, %c0_8], %9 {strides = array<i32>} : memref<1x32x256xf32, #tpu.memory_space<vmem>>, vector<1x32x256xf32>,
    return
  }
  func.func @transform_0(%arg0: i32, %arg1: i32) -> (i32, i32, i32) {
    %c0_i32 = arith.constant 0 : i32
    %c0_i32_0 = arith.constant 0 : i32
    return %arg0, %c0_i32, %arg1 : i32, i32, i32
  }
  func.func @transform_1(%arg0: i32, %arg1: i32) -> (i32, i32) {
    %c0_i32 = arith.constant 0 : i32
    %c0_i32_0 = arith.constant 0 : i32
    %c0_i32_1 = arith.constant 0 : i32
    return %c0_i32, %c0_i32_0 : i32, i32
  }
  func.func @transform_2(%arg0: i32, %arg1: i32) -> (i32, i32) {
    %c0_i32 = arith.constant 0 : i32
    %c0_i32_0 = arith.constant 0 : i32
    %c0_i32_1 = arith.constant 0 : i32
    return %c0_i32, %c0_i32_0 : i32, i32
  }
  func.func @transform_3(%arg0: i32, %arg1: i32) -> (i32, i32, i32) {
    %c0_i32 = arith.constant 0 : i32
    %c0_i32_0 = arith.constant 0 : i32
    return %arg0, %c0_i32, %arg1 : i32, i32, i32
  }
}

</mosaic_0001>

<bundles_post_ra>
// kernel: process_layer_graph.1
= control target key start
LH: loop header
LB: loop body
LE: loop exit
PB: predicated region body
PF: predicated region fallthrough
CT: control target
= control target key end

     0   :  { %s539_s12 = smov 0   ;;  %s541_s13 = smov 0   ;;  %s600_s0 = inlined_call_operand.vmem [shape: f32[2,4,256], index: 0, kind: input, shape index: {}]   ;;  %s601_s1 = inlined_call_operand.vmem [shape: f32[32,4], index: 1, kind: input, shape index: {}]   ;;  %s602_s2 = inlined_call_operand.vmem [shape: f32[32,1], index: 2, kind: input, shape index: {}]   ;;  %s603_s3 = inlined_call_operand.vmem [shape: f32[2,32,256], index: 3, kind: output, shape index: {}]  }
   0x1   :  { %s543_s14 = smov 0  }
   0x2 LB: > { %s25_s15 = sadd.s32 1, %s511_s13  ;;  %p447_p0 = scmp.ge.s32.totalorder %s515_s14, 1  ;;  %s515_s14 = sphi %s543_s14, %s13_s14   ;;  %s511_s13 = sphi %s541_s13, %s605_s13   ;;  %s507_s12 = sphi %s539_s12, %s604_s12  }
   0x3   : > { %p27_p1 = scmp.ge.s32.totalorder %s25_s15, 2  ;;  %p158_p2 = scmp.lt.s32.totalorder %s515_s14, 3 }
   0x5   : > { %s607_s15 = smov (%p27_p1, %s25_s15), 0  ;;  %p159_p3 = pnand %p447_p0, %p158_p2 }
   0x6   : > { %p191_p4 = scmp.lt.s32.totalorder (!%p159_p3), %s507_s12, 1 }
   0x7   : > { %162 = sbr.rel (%p159_p3) target bundleno = 223 (0xdf), region = 32 }
   0xc   : > { %v517_v0 = vmov 0.0   ;;  %v217_v1 = vld [vmem:[%s602_s2 + $0x10] sm:$0xff]  ;;  %s609_s12 = smov (!%p191_p4, %s507_s12), 1  ;;  %v518_v2 = vmov 0   ;;  %v215_v3 = vld [vmem:[%s602_s2] sm:$0xff]  ;;  %v218_v4 = vld [vmem:[%s602_s2 + $0x18] sm:$0xff] }
   0xd   : > { %323 = vmatprep.mubr.f32.mxu0 %v517_v0  ;;  %335 = vmatprep.mubr.f32.mxu1 %v517_v0  ;;  %s460_s20 = sshll.u32 %s609_s12, 3  ;;  %v216_v5 = vld [vmem:[%s602_s2 + $0x8] sm:$0xff]  ;;  %vm254_vm0 = vcmask 1043456   ;;  %v210_v8 = vld [vmem:[%s601_s1] sm:$0xff]  ;;  %vm241_vm1 = vcmask 31744   ;;  %v212_v9 = vld [vmem:[%s601_s1 + $0x10] sm:$0xff] }
   0xe   : > { %491 = vset.pattern.permute.xlu1 %v518_v2  ;;  %490 = vset.pattern.permute.xlu0 %v518_v2  ;;  %s198_s27 = scalar_lea.vmem %s600_s0, %s460_s20  ;;  %v211_v10 = vld [vmem:[%s601_s1 + $0x8] sm:$0xff]  ;;  %v213_v11 = vld [vmem:[%s601_s1 + $0x18] sm:$0xff]  ;;  %s461_s9 = sshll.u32 %s609_s12, 6 }
   0xf   : > { %231 = vperm.xlu1 %491, %v217_v1   ;;  %221 = vperm.xlu0 %490, %v215_v3   ;;  %v214_v6 = vld [vmem:[%s198_s27] sm:$0xff]  ;;  %s208_s16 = scalar_lea.vmem %s603_s3, %s461_s9 }
  0x10   : > { %v240_v7 = vcombine.high %v214_v6, %v214_v6 }
  0x12   : > { %452 = vmatprep.subr.msk.mxu0 %vm254_vm0, %v240_v7  ;;  %462 = vmatprep.subr.msk.mxu1 %vm254_vm0, %v240_v7 }
  0x13   : > { %236 = vperm.xlu1 %491, %v218_v4   ;;  %226 = vperm.xlu0 %490, %v216_v5  }
  0x14   : > { %453 = vmatpush1.msk.msra.mxu0 %vm254_vm0, %v214_v6  ;;  %463 = vmatpush1.msk.msra.mxu1 %vm254_vm0, %v214_v6 }
  0x15   : > { %454 = vmatmul.mubr.msk.f32.vlgmr.msra.gmra.mxu0 %vm241_vm1, %v210_v8  ;;  %456 = vmatmul.mubr.msk.f32.vlgmr.msra.gmra.mxu1 %vm241_vm1, %v212_v9 }
  0x16   : > { %329 = vmatprep.mubr.f32.mxu0 %v517_v0  ;;  %341 = vmatprep.mubr.f32.mxu1 %v517_v0 }
  0x19   : > { %455 = vmatmul.mubr.msk.f32.gmra.mxu0 %vm241_vm1, %v211_v10  ;;  %457 = vmatmul.mubr.msk.f32.gmra.mxu1 %vm241_vm1, %v213_v11 }
  0x8a   : > { %v232_v12 = vpop.permute.xlu1 %231  ;;  %v222_v13 = vpop.permute.xlu0 %221 }
  0x8e   : > { %v237_v20 = vpop.permute.xlu1 %236  ;;  %v227_v21 = vpop.permute.xlu0 %226 }
  0xd5   : > { %v325_v14 = vpop.f32.mrf.mxu0  ;;  %v337_v15 = vpop.f32.mrf.mxu1 }
  0xd6   : > { %v326_v16 = vadd.f32 %v325_v14, %v222_v13  ;;  %v338_v17 = vadd.f32 %v337_v15, %v232_v12 }
  0xd7   : > { %v327_v18 = vpop.f32.mrf.mxu0  ;;  %v339_v19 = vpop.f32.mrf.mxu1 }
  0xd8   : > { %348 = vst [vmem:[%s208_s16] sm:$0xff] %v326_v16  ;;  %352 = vst [vmem:[%s208_s16 + $0x20] sm:$0xff] %v338_v17  ;;  %v328_v22 = vadd.f32 %v327_v18, %v222_v13  ;;  %v340_v23 = vadd.f32 %v339_v19, %v232_v12 }
  0xd9   : > { %v331_v24 = vpop.f32.mrf.mxu0  ;;  %v343_v25 = vpop.f32.mrf.mxu1 }
  0xda   : > { %349 = vst [vmem:[%s208_s16 + $0x8] sm:$0xff] %v328_v22  ;;  %353 = vst [vmem:[%s208_s16 + $0x28] sm:$0xff] %v340_v23  ;;  %v332_v26 = vadd.f32 %v331_v24, %v227_v21  ;;  %v344_v27 = vadd.f32 %v343_v25, %v237_v20 }
  0xdb   : > { %v333_v28 = vpop.f32.mrf.mxu0  ;;  %v345_v29 = vpop.f32.mrf.mxu1 }
  0xdc   : > { %350 = vst [vmem:[%s208_s16 + $0x10] sm:$0xff] %v332_v26  ;;  %354 = vst [vmem:[%s208_s16 + $0x30] sm:$0xff] %v344_v27  ;;  %v334_v30 = vadd.f32 %v333_v28, %v227_v21  ;;  %v346_v31 = vadd.f32 %v345_v29, %v237_v20 }
  0xde   : > { %351 = vst [vmem:[%s208_s16 + $0x18] sm:$0xff] %v334_v30  ;;  %355 = vst [vmem:[%s208_s16 + $0x38] sm:$0xff] %v346_v31 }
  0xdf PF: > { %s13_s14 = sadd.s32 1, %s515_s14   ;;  %s604_s12 = smov %s511_s13 }
  0xe0   : > { %p10_p5 = scmp.ge.s32.totalorder %s13_s14, 4   ;;  %s605_s13 = smov %s607_s15 }
  0xe2   :  { %12 = sbr.rel (!%p10_p5) target bundleno = 2 (0x2), region = 62 }

</bundles_post_ra>
